<compile_context>
chip_gen: v7x
topology: tpu7x:2x2x1
jax: 0.10.0
libtpu: 0.0.40
codegen_flags: <defaults>
</compile_context>

<pallas_src>
import functools

import jax
import jax.numpy as jnp
from jax.experimental import pallas as pl
from jax.experimental.pallas import tpu as pltpu


# ---------------------------------------------------------------------------
# Kernel helpers
# ---------------------------------------------------------------------------
def _block_row_loss(x, t, m):
    """Per-row soft-CE over one (tn, C) block.  Returns (tn, 1) f32."""
    x = x.astype(jnp.float32)
    t = t.astype(jnp.float32)
    x_max = jnp.max(x, axis=-1, keepdims=True)                   # (tn, 1)
    z = x - x_max                                                # (tn, C)
    lse = jnp.log(jnp.sum(jnp.exp(z), axis=-1, keepdims=True))   # (tn, 1)
    tm = t if m is None else t * m.astype(jnp.float32)           # (tn, C)
    # loss_row = sum_j -t*m*(z - lse) = sum(tm)*lse - sum(tm*z)
    s_tm = jnp.sum(tm, axis=-1, keepdims=True)                   # (tn, 1)
    s_tmz = jnp.sum(tm * z, axis=-1, keepdims=True)              # (tn, 1)
    return s_tm * lse - s_tmz                                    # (tn, 1)


def _accumulate_partial(row_loss, o_ref, *, n_rows, tn, tiles_per_core):
    """Mask tail rows and add the block's (unscaled) sum into this core's partial."""
    c = pl.program_id(0)
    i = pl.program_id(1)
    start = (c * tiles_per_core + i) * tn
    row_ids = jax.lax.broadcasted_iota(jnp.int32, row_loss.shape, 0)  # (tn, 1)
    # jnp.where (not multiply) so garbage/NaN in padded tail rows cannot leak.
    row_loss = jnp.where(row_ids < (n_rows - start), row_loss, 0.0)
    o_ref[...] += jnp.sum(row_loss, axis=0, keepdims=True).reshape(1, 1, 1)


def _soft_ce_kernel_nomask(x_ref, t_ref, o_ref, *, n_rows, tn, tiles_per_core):
    @pl.when(pl.program_id(1) == 0)
    def _():
        o_ref[...] = jnp.zeros_like(o_ref)

    row_loss = _block_row_loss(x_ref[...], t_ref[...], None)
    _accumulate_partial(row_loss, o_ref, n_rows=n_rows, tn=tn,
                        tiles_per_core=tiles_per_core)


def _soft_ce_kernel_masked(x_ref, t_ref, m_ref, o_ref, *, n_rows, tn,
                           tiles_per_core):
    @pl.when(pl.program_id(1) == 0)
    def _():
        o_ref[...] = jnp.zeros_like(o_ref)

    # m_ref is (1, C) (VMEM-resident, broadcast over sublanes) or (tn, C).
    row_loss = _block_row_loss(x_ref[...], t_ref[...], m_ref[...])
    _accumulate_partial(row_loss, o_ref, n_rows=n_rows, tn=tn,
                        tiles_per_core=tiles_per_core)


# ---------------------------------------------------------------------------
# Wrapper
# ---------------------------------------------------------------------------
def _vmem_capacity_bytes():
    """Per-core VMEM capacity; conservative (v7x = 64 MiB) if query fails."""
    try:
        info = pltpu.get_tpu_info()
        cap = getattr(info, "vmem_capacity_bytes", None)
        if cap:
            return int(cap)
    except Exception:
        pass
    return 64 << 20


def _pick_row_tile(n_rows, per_row_bytes, budget, align, max_rows_per_block):
    """Largest aligned row tile that fits the VMEM budget (cdiv grid + in-kernel
    tail masking means it no longer has to divide N)."""
    cap = (budget // max(per_row_bytes, 1)) // align * align
    cap = max(cap, align)
    if max_rows_per_block is not None:
        cap = min(cap, max(align, (max_rows_per_block // align) * align))
    if n_rows <= cap:
        return n_rows            # full-extent block is always layout-legal
    return cap


def soft_target_cross_entropy(x, target, mask=None, *, max_rows_per_block=None):
    """Equivalent of SoftTargetCrossEntropy.forward.

    x, target: (N, C).  mask: None, (C,), or (N, C) (float/bf16/int/bool).
    Returns a scalar: mean over rows of the per-row (masked) loss.
    """
    N, C = x.shape
    assert target.shape == (N, C)

    x_b = jnp.dtype(x.dtype).itemsize
    t_b = jnp.dtype(target.dtype).itemsize

    mask_arr = None
    mask_streamed = False
    if mask is not None:
        mask_arr = jnp.asarray(mask)
        if mask_arr.dtype == jnp.bool_:
            # Stream 1 byte/elem, cast to f32 in-kernel (mask is pure HBM traffic).
            mask_arr = mask_arr.astype(jnp.int8)
        if mask_arr.ndim == 1:
            assert mask_arr.shape == (C,)
            mask_arr = mask_arr.reshape(1, C)     # VMEM-resident, DMA'd once
        else:
            assert mask_arr.shape == (N, C)
            mask_streamed = True

    m_b = jnp.dtype(mask_arr.dtype).itemsize if mask_streamed else 0

    # Sublane-packing alignment of the narrowest streamed dtype
    # (f32 -> 8 rows, bf16 -> 16, int8 -> 32).
    min_item = min([b for b in (x_b, t_b, m_b) if b > 0])
    align = max(8, 32 // min_item)

    # Per-row footprint: double-buffered streamed inputs + ~6 f32 tile temps.
    per_row_bytes = C * (2 * (x_b + t_b + m_b) + 6 * 4)

    vmem_cap = _vmem_capacity_bytes()
    budget = max(8 << 20, min(int(vmem_cap * 0.45), 56 << 20))
    tn = _pick_row_tile(N, per_row_bytes, budget, align, max_rows_per_block)

    num_blocks = pl.cdiv(N, tn)
    num_par = 2 if num_blocks >= 2 else 1          # v7x megacore; harmless on 1-TC chips
    tiles_per_core = pl.cdiv(num_blocks, num_par)
    grid = (num_par, tiles_per_core)

    block_bytes = tn * per_row_bytes + C * 4 + (2 << 20)
    vmem_limit = int(min(int(vmem_cap * 0.75), max(block_bytes, 16 << 20)))

    # Clamp the row-block index so duplicated / tail grid steps stay in-bounds;
    # their rows are zeroed in-kernel.
    def row_map(c, i):
        return (jnp.minimum(c * tiles_per_core + i, num_blocks - 1), 0)

    # Small tiles over many steps expose DMA latency -> 3-deep buffering.
    use_triple = (tn < 256) and (tiles_per_core >= 4)

    def stream_spec(rows):
        if use_triple:
            return pl.BlockSpec((rows, C), row_map, pipeline_mode=pl.Buffered(3))
        return pl.BlockSpec((rows, C), row_map)

    x_spec = stream_spec(tn)
    t_spec = stream_spec(tn)
    out_spec = pl.BlockSpec((1, 1, 1), lambda c, i: (c, 0, 0))   # per-core partial
    out_shape = jax.ShapeDtypeStruct((num_par, 1, 1), jnp.float32)

    compiler_params = pltpu.CompilerParams(
        dimension_semantics=("parallel", "arbitrary"),
        vmem_limit_bytes=vmem_limit,
    )
    kern_kwargs = dict(n_rows=N, tn=tn, tiles_per_core=tiles_per_core)

    if mask_arr is None:
        out = pl.pallas_call(
            functools.partial(_soft_ce_kernel_nomask, **kern_kwargs),
            out_shape=out_shape,
            grid_spec=pltpu.PrefetchScalarGridSpec(
                num_scalar_prefetch=0,
                grid=grid,
                in_specs=[x_spec, t_spec],
                out_specs=out_spec,
            ),
            compiler_params=compiler_params,
        )(x, target)
    else:
        if mask_streamed:
            m_spec = stream_spec(tn)
        else:
            m_spec = pl.BlockSpec((1, C), lambda c, i: (0, 0))
        out = pl.pallas_call(
            functools.partial(_soft_ce_kernel_masked, **kern_kwargs),
            out_shape=out_shape,
            grid_spec=pltpu.PrefetchScalarGridSpec(
                num_scalar_prefetch=0,
                grid=grid,
                in_specs=[x_spec, t_spec, m_spec],
                out_specs=out_spec,
            ),
            compiler_params=compiler_params,
        )(x, target, mask_arr)

    # Sum per-core partials and apply the 1/N mean once (moved out of kernel).
    return jnp.sum(out) / jnp.float32(N)


# ---------------------------------------------------------------------------
# Pure-JAX reference mirroring the PyTorch module
# ---------------------------------------------------------------------------
def _reference(x, target, mask=None):
    logp = jax.nn.log_softmax(x.astype(jnp.float32), axis=-1)
    loss = -target.astype(jnp.float32) * logp
    if mask is not None:
        mask = jnp.asarray(mask, dtype=jnp.float32)
        if mask.ndim == 1:
            mask = jnp.broadcast_to(mask[None, :], loss.shape)
        loss = loss * mask
    return jnp.mean(jnp.sum(loss, axis=-1))


if __name__ == "__main__":
    key = jax.random.PRNGKey(0)
    k1, k2, k3, k4, k5, k6 = jax.random.split(key, 6)

    # --- Small shapes consistent with the module: batch=8, classes=128 -----
    N, C = 8, 128
    x = jax.random.normal(k1, (N, C), dtype=jnp.float32)
    target = jax.nn.softmax(jax.random.normal(k2, (N, C), dtype=jnp.float32), axis=-1)
    mask1d = (jax.random.uniform(k3, (C,)) > 0.3).astype(jnp.float32)

    # no-mask path (2-input kernel, no mask bytes streamed)
    out_nomask = soft_target_cross_entropy(x, target, None)
    jax.block_until_ready(out_nomask)
    ref_nomask = _reference(x, target, None)
    assert jnp.allclose(out_nomask, ref_nomask, rtol=1e-5, atol=1e-5), (
        out_nomask, ref_nomask)

    # 1-D mask path (mask kept VMEM-resident as (1, C))
    out_mask = soft_target_cross_entropy(x, target, mask1d)
    jax.block_until_ready(out_mask)
    ref_mask = _reference(x, target, mask1d)
    assert jnp.allclose(out_mask, ref_mask, rtol=1e-5, atol=1e-5), (
        out_mask, ref_mask)

    # --- Multi-step grid, parallel core axis, bf16 streaming, int8 (bool) ---
    # --- mask, and a non-multiple batch (tail rows masked in-kernel).     ---
    N2, C2 = 120, 256
    xb = jax.random.normal(k4, (N2, C2), dtype=jnp.bfloat16)
    tb = jax.nn.softmax(
        jax.random.normal(k5, (N2, C2), dtype=jnp.float32), axis=-1
    ).astype(jnp.bfloat16)
    mask2d = jax.random.uniform(k6, (N2, C2)) > 0.5          # bool -> int8 stream

    out2 = soft_target_cross_entropy(xb, tb, mask2d, max_rows_per_block=32)
    jax.block_until_ready(out2)
    ref2 = _reference(xb.astype(jnp.float32), tb.astype(jnp.float32), mask2d)
    assert jnp.allclose(out2, ref2, rtol=1e-3, atol=1e-3), (out2, ref2)

    # no-mask path with tail masking + inner-axis accumulation
    out3 = soft_target_cross_entropy(xb, tb, None, max_rows_per_block=32)
    jax.block_until_ready(out3)
    ref3 = _reference(xb.astype(jnp.float32), tb.astype(jnp.float32), None)
    assert jnp.allclose(out3, ref3, rtol=1e-3, atol=1e-3), (out3, ref3)

    print("KERNEL_OK")
</pallas_src>

<mosaic_0001>
module attributes {stable_mosaic.version = 11 : i64} {
  func.func @_soft_ce_kernel_nomask(%arg0: i32, %arg1: i32, %arg2: memref<8x128xf32, #tpu.memory_space<vmem>>, %arg3: memref<8x128xf32, #tpu.memory_space<vmem>>, %arg4: memref<1x1x1xf32, #tpu.memory_space<vmem>>) attributes {dimension_semantics = [#tpu.dimension_semantics<parallel>, #tpu.dimension_semantics<arbitrary>], iteration_bounds = array<i64: 1, 1>, scalar_prefetch = 0 : i64, scratch_operands = 0 : i64, tpu.core_type = #tpu.core_type<tc>, window_params = [{transform_indices = @transform_0, window_bounds = array<i64: 8, 128>}, {transform_indices = @transform_1, window_bounds = array<i64: 8, 128>}, {transform_indices = @transform_2, window_bounds = array<i64: 1, 1, 1>}]} {
    %c0_i32 = arith.constant 0 : i32
    %0 = arith.cmpi eq, %arg1, %c0_i32 : i32
    %1 = arith.extui %0 : i1 to i32
    %c0_i32_0 = arith.constant 0 : i32
    %2 = arith.cmpi ne, %1, %c0_i32_0 : i32
    scf.if %2 {
      %cst_16 = arith.constant 0.000000e+00 : f32
      %35 = vector.broadcast %cst_16 : f32 to vector<1x1x1xf32>
      %c0_17 = arith.constant 0 : index
      %c0_18 = arith.constant 0 : index
      %c0_19 = arith.constant 0 : index
      %36 = vector.load %arg4[%c0_17, %c0_18, %c0_19] : memref<1x1x1xf32, #tpu.memory_space<vmem>>, vector<1x1x1xf32>
      tpu.vector_store %arg4[%c0_17, %c0_18, %c0_19], %35 {strides = array<i32>} : memref<1x1x1xf32, #tpu.memory_space<vmem>>, vector<1x1x1xf32>,
    } else {
    }
    %c0 = arith.constant 0 : index
    %c0_1 = arith.constant 0 : index
    %3 = vector.load %arg2[%c0, %c0_1] : memref<8x128xf32, #tpu.memory_space<vmem>>, vector<8x128xf32>
    %c0_2 = arith.constant 0 : index
    %c0_3 = arith.constant 0 : index
    %4 = vector.load %arg3[%c0_2, %c0_3] : memref<8x128xf32, #tpu.memory_space<vmem>>, vector<8x128xf32>
    %cst = arith.constant dense<0xFF800000> : vector<8xf32>
    %5 = vector.multi_reduction <maximumf>, %3, %cst [1] : vector<8x128xf32> to vector<8xf32>
    %6 = vector.shape_cast %5 : vector<8xf32> to vector<8x1xf32>
    %7 = vector.broadcast %6 : vector<8x1xf32> to vector<8x128xf32>
    %8 = arith.subf %3, %7 : vector<8x128xf32>
    %9 = math.exp %8 : vector<8x128xf32>
    %cst_4 = arith.constant dense<0.000000e+00> : vector<8xf32>
    %10 = vector.multi_reduction <add>, %9, %cst_4 [1] : vector<8x128xf32> to vector<8xf32>
    %11 = vector.shape_cast %10 : vector<8xf32> to vector<8x1xf32>
    %12 = math.log %11 : vector<8x1xf32>
    %cst_5 = arith.constant dense<0.000000e+00> : vector<8xf32>
    %13 = vector.multi_reduction <add>, %4, %cst_5 [1] : vector<8x128xf32> to vector<8xf32>
    %14 = vector.shape_cast %13 : vector<8xf32> to vector<8x1xf32>
    %15 = arith.mulf %4, %8 : vector<8x128xf32>
    %cst_6 = arith.constant dense<0.000000e+00> : vector<8xf32>
    %16 = vector.multi_reduction <add>, %15, %cst_6 [1] : vector<8x128xf32> to vector<8xf32>
    %17 = vector.shape_cast %16 : vector<8xf32> to vector<8x1xf32>
    %18 = arith.mulf %14, %12 : vector<8x1xf32>
    %19 = arith.subf %18, %17 : vector<8x1xf32>
    %c1_i32 = arith.constant 1 : i32
    %20 = arith.muli %arg0, %c1_i32 : i32
    %21 = arith.addi %20, %arg1 : i32
    %c8_i32 = arith.constant 8 : i32
    %22 = arith.muli %21, %c8_i32 : i32
    %23 = tpu.iota {dimensions = array<i32: 0>} : vector<8x1xi32>
    %c8_i32_7 = arith.constant 8 : i32
    %24 = arith.subi %c8_i32_7, %22 : i32
    %25 = vector.broadcast %24 : i32 to vector<8x1xi32>
    %26 = arith.cmpi slt, %23, %25 : vector<8x1xi32>
    %cst_8 = arith.constant 0.000000e+00 : f32
    %27 = vector.broadcast %cst_8 : f32 to vector<8x1xf32>
    %28 = arith.select %26, %19, %27 : vector<8x1xi1>, vector<8x1xf32>
    %c0_9 = arith.constant 0 : index
    %c0_10 = arith.constant 0 : index
    %c0_11 = arith.constant 0 : index
    %29 = vector.load %arg4[%c0_9, %c0_10, %c0_11] : memref<1x1x1xf32, #tpu.memory_space<vmem>>, vector<1x1x1xf32>
    %cst_12 = arith.constant dense<0.000000e+00> : vector<1xf32>
    %30 = vector.multi_reduction <add>, %28, %cst_12 [0] : vector<8x1xf32> to vector<1xf32>
    %31 = vector.shape_cast %30 : vector<1xf32> to vector<1x1xf32>
    %32 = vector.shape_cast %31 : vector<1x1xf32> to vector<1x1x1xf32>
    %33 = arith.addf %29, %32 : vector<1x1x1xf32>
    %c0_13 = arith.constant 0 : index
    %c0_14 = arith.constant 0 : index
    %c0_15 = arith.constant 0 : index
    %34 = vector.load %arg4[%c0_13, %c0_14, %c0_15] : memref<1x1x1xf32, #tpu.memory_space<vmem>>, vector<1x1x1xf32>
    tpu.vector_store %arg4[%c0_13, %c0_14, %c0_15], %33 {strides = array<i32>} : memref<1x1x1xf32, #tpu.memory_space<vmem>>, vector<1x1x1xf32>,
    return
  }
  func.func @transform_0(%arg0: i32, %arg1: i32) -> (i32, i32) {
    %c1_i32 = arith.constant 1 : i32
    %0 = arith.muli %arg0, %c1_i32 : i32
    %1 = arith.addi %0, %arg1 : i32
    %c0_i32 = arith.constant 0 : i32
    %2 = arith.minsi %1, %c0_i32 : i32
    %c0_i32_0 = arith.constant 0 : i32
    %c0_i32_1 = arith.constant 0 : i32
    return %2, %c0_i32_0 : i32, i32
  }
  func.func @transform_1(%arg0: i32, %arg1: i32) -> (i32, i32) {
    %c1_i32 = arith.constant 1 : i32
    %0 = arith.muli %arg0, %c1_i32 : i32
    %1 = arith.addi %0, %arg1 : i32
    %c0_i32 = arith.constant 0 : i32
    %2 = arith.minsi %1, %c0_i32 : i32
    %c0_i32_0 = arith.constant 0 : i32
    %c0_i32_1 = arith.constant 0 : i32
    return %2, %c0_i32_0 : i32, i32
  }
  func.func @transform_2(%arg0: i32, %arg1: i32) -> (i32, i32, i32) {
    %c0_i32 = arith.constant 0 : i32
    %c0_i32_0 = arith.constant 0 : i32
    %c0_i32_1 = arith.constant 0 : i32
    return %arg0, %c0_i32, %c0_i32_0 : i32, i32, i32
  }
}

</mosaic_0001>

<bundles_post_ra>
// kernel: tpu_custom_call.1
= control target key start
LH: loop header
LB: loop body
LE: loop exit
PB: predicated region body
PF: predicated region fallthrough
CT: control target
= control target key end

     0   :  { %7 = vsyncpa [#allocation3], 0  ;;  %s251_s0 = inlined_call_operand.hbm [shape: f32[8,128], index: 0, kind: input, shape index: {}]   ;;  %s252_s1 = inlined_call_operand.hbm [shape: f32[8,128], index: 1, kind: input, shape index: {}]   ;;  %s253_s2 = inlined_call_operand.hbm [shape: f32[1,1,1], index: 2, kind: output, shape index: {}]  }
   0x1   :  { %8 = vsyncpa [#allocation6], 0 }
   0x2   :  { %9 = vsyncpa [#allocation4], 0  ;;  %s194_s9 = smov [#allocation2]   ;;  %s195_s11 = smov [#allocation5]  }
   0x3   :  { %s21_s10 = sshll.u32 %s194_s9, 4  ;;  %s36_s12 = sshll.u32 %s195_s11, 4  ;;  %s22_s10 = int_to_ptr.vmem [resolvable:$true] %s21_s10  ;;  %s37_s12 = int_to_ptr.vmem [resolvable:$true] %s36_s12 }
   0x4   :  { %s122_s15 = scalar_lea.hbm %s251_s0, 128 }
   0x5   :  { %p123_p0 = scmp.ne.s32.totalorder %s251_s0, %s122_s15  ;;  %p126_p1 = scmp.lt.u32.totalorder %s122_s15, %s251_s0 }
   0x7   :  { %p128_p2 = pnand %p126_p1, %p123_p0 }
   0x9   :  { %131 = shalt.err (!%p128_p2)
}
   0xa   :  { %s132_s20 = scalar_lea.vmem %s22_s10, 128  ;;  %p137_p4 = scmp.lt.s32.totalorder %s22_s10, %s22_s10 }
   0xb   :  { %p133_p3 = scmp.ne.s32.totalorder %s22_s10, %s132_s20  ;;  %p138_p5 = scmp.lt.s32.totalorder %s132_s20, %s132_s20 }
   0xd   :  { %p139_p6 = por %p138_p5, %p137_p4 }
   0xf   :  { %p140_p7 = pnand %p139_p6, %p133_p3 }
  0x11   :  { %143 = shalt.err (!%p140_p7)
}
  0x12   :  { %24 = dma.hbm_to_vmem [thread:$0]  %s251_s0, 128, %s22_s10, [#allocation3]  }
  0x13   :  { %s144_s25 = scalar_lea.hbm %s252_s1, 128 }
  0x14   :  { %p145_p8 = scmp.ne.s32.totalorder %s252_s1, %s144_s25  ;;  %p148_p9 = scmp.lt.u32.totalorder %s144_s25, %s252_s1 }
  0x16   :  { %p150_p10 = pnand %p148_p9, %p145_p8 }
  0x18   :  { %153 = shalt.err (!%p150_p10)
}
  0x19   :  { %s154_s30 = scalar_lea.vmem %s37_s12, 128  ;;  %p159_p12 = scmp.lt.s32.totalorder %s37_s12, %s37_s12 }
  0x1a   :  { %p155_p11 = scmp.ne.s32.totalorder %s37_s12, %s154_s30  ;;  %p160_p13 = scmp.lt.s32.totalorder %s154_s30, %s154_s30 }
  0x1c   :  { %p161_p0 = por %p160_p13, %p159_p12 }
  0x1e   :  { %p162_p1 = pnand %p161_p0, %p155_p11 }
  0x20   :  { %165 = shalt.err (!%p162_p1)
}
  0x21   :  { %39 = dma.hbm_to_vmem [thread:$0]  %s252_s1, 128, %s37_s12, [#allocation6]  }
  0x22   :  { %188 = dma.done.wait [#allocation3], 128  }
  0x23   :  { %189 = vsyncadd [#allocation3], 4294967168 }
  0x24   :  { %190 = dma.done.wait [#allocation6], 128  }
  0x25   :  { %191 = vsyncadd [#allocation6], 4294967168  ;;  %v58_v0 = vld [vmem:[#allocation2] sm:$0xff]  ;;  %v59_v1 = vld [vmem:[#allocation5] sm:$0xff]  ;;  %vm56_vm0 = vcmask 0   ;;  %v196_v7 = vmov 0.0  }
  0x26   :  { %60 = vmax.xlane.f32.xlu0 %v58_v0  ;;  %69 = vadd.xlane.f32.xlu1 %v59_v1  ;;  %57 = vst.msk [vmem:[#allocation7] sm:$0x1] %vm56_vm0, %v196_v7  ;;  %s197_s1 = smov [#allocation7]  }
  0x27   :  { %s100_s4 = sshll.u32 %s197_s1, 4  ;;  %s101_s4 = int_to_ptr.vmem [resolvable:$true] %s100_s4 }
  0x28   :  { %s166_s5 = scalar_lea.vmem %s101_s4, 16  ;;  %s170_s6 = scalar_lea.vmem %s101_s4, 32 }
  0x29   :  { %p167_p2 = scmp.ne.s32.totalorder %s101_s4, %s166_s5  ;;  %p171_p3 = scmp.lt.s32.totalorder %s101_s4, %s101_s4 }
  0x2a   :  { %p172_p4 = scmp.lt.s32.totalorder %s170_s6, %s166_s5 }
  0x2c   :  { %p173_p5 = por %p172_p4, %p171_p3 }
  0x2d   :  { %v84_v20 = vld [vmem:[#allocation7] sm:$0x1] }
  0x2e   :  { %p174_p6 = pnand %p173_p5, %p167_p2 }
  0xb3   :  { %v61_v2 = vpop.xlane.xlu0 %60  ;;  %v70_v9 = vpop.xlane.xlu1 %69 }
  0xb4   :  { %v62_v3 = vsub.f32 %v58_v0, %v61_v2 }
  0xb6   :  { %v63_v4 = vmul.f32 1.442695, %v62_v3  ;;  %v71_v5 = vmul.f32 %v62_v3, %v59_v1 }
  0xb8   :  { %118 = vpow2.f32 %v63_v4  ;;  %72 = vadd.xlane.f32.xlu1 %v71_v5 }
  0xc2   :  { %v119_v6 = vpop.eup %118 }
  0xc3   :  { %65 = vadd.xlane.f32.xlu0 %v119_v6 }
 0x145   :  { %v73_v13 = vpop.xlane.xlu1 %72 }
 0x150   :  { %v66_v8 = vpop.xlane.xlu0 %65 }
 0x151   :  { %120 = vlog2.f32 %v66_v8 }
 0x15b   :  { %v121_v10 = vpop.eup %120 }
 0x15c   :  { %v68_v11 = vmul.f32 0.6931472, %v121_v10 }
 0x15e   :  { %v74_v12 = vmul.f32 %v70_v9, %v68_v11 }
 0x160   :  { %v75_v14 = vsub.f32 %v74_v12, %v73_v13 }
 0x162   :  { %v85_v15 = vrot.slane %v75_v14, 4 }
 0x164   :  { %v86_v16 = vadd.f32 %v85_v15, %v75_v14 }
 0x166   :  { %v87_v17 = vrot.slane %v86_v16, 2 }
 0x168   :  { %v88_v18 = vadd.f32 %v87_v17, %v86_v16 }
 0x16a   :  { %v89_v19 = vrot.slane %v88_v18, 1 }
 0x16c   :  { %v90_v21 = vadd.f32 %v89_v19, %v88_v18 }
 0x16e   :  { %v91_v22 = vadd.f32 %v90_v21, %v84_v20 }
 0x170   :  { %93 = vst.msk [vmem:[#allocation7] sm:$0x1] %vm56_vm0, %v91_v22 }
 0x171   :  { %177 = shalt.err (!%p174_p6)
}
 0x172   :  { %s178_s9 = scalar_lea.hbm %s253_s2, 16 }
 0x173   :  { %p179_p7 = scmp.ne.s32.totalorder %s253_s2, %s178_s9  ;;  %p182_p8 = scmp.lt.u32.totalorder %s178_s9, %s253_s2 }
 0x175   :  { %p184_p9 = pnand %p182_p8, %p179_p7 }
 0x177   :  { %187 = shalt.err (!%p184_p9)
}
 0x178   :  { %103 = dma.vmem_to_hbm [thread:$0]  %s101_s4, 16, %s253_s2, [#allocation4]  }
 0x179   :  { %192 = dma.done.wait [#allocation4], 16  }
 0x17a   :  { %193 = vsyncadd [#allocation4], 4294967280 }
 0x17b   :  { %107 = vsyncpa [#allocation3], 1 }
 0x17c   :  { %108 = vsyncpa [#allocation6], 1 }
 0x17d   :  { %109 = vsyncpa [#allocation4], 1 }

</bundles_post_ra>
